<compile_context>
chip_gen: v5e
topology: v5e:2x2
jax: 0.10.0
libtpu: 0.0.40
codegen_flags: <defaults>
</compile_context>

<pallas_src>
import jax
import jax.numpy as jnp
from jax import lax
from jax.experimental import pallas as pl
from jax.experimental.pallas import tpu as pltpu


# ---------------------------------------------------------------------------
# Parameter slab layout (rows x 128 lanes, f32):
#   rows  0:16, cols 0:4    -> W1 (16, 4)      rows  0:16, cols 4:5   -> b1
#   rows 16:32, cols 0:16   -> W2 (16, 16)     rows 16:32, cols 16:17 -> b2
#   rows 32:34, cols 0:16   -> W3 (2, 16)      rows 32:34, cols 16:17 -> b3
# ---------------------------------------------------------------------------
PARAM_ROWS = 40          # 34 used, padded to a multiple of 8 (f32 sublane)
PARAM_COLS = 128
_LANE = 128
_MAX_TILE = 32768        # (4+2)*32768*4B*2buf ≈ 1.5 MiB VMEM — trivial on all gens


def _cdiv(a, b):
    return (a + b - 1) // b


def _round_up(a, b):
    return _cdiv(a, b) * b


def pack_params(p):
    """Pack PyTorch-layout weights/biases into one (40, 128) slab.  Call ONCE."""
    slab = jnp.zeros((PARAM_ROWS, PARAM_COLS), jnp.float32)
    slab = slab.at[0:16, 0:4].set(p["w1"].astype(jnp.float32))
    slab = slab.at[0:16, 4:5].set(p["b1"].astype(jnp.float32)[:, None])
    slab = slab.at[16:32, 0:16].set(p["w2"].astype(jnp.float32))
    slab = slab.at[16:32, 16:17].set(p["b2"].astype(jnp.float32)[:, None])
    slab = slab.at[32:34, 0:16].set(p["w3"].astype(jnp.float32))
    slab = slab.at[32:34, 16:17].set(p["b3"].astype(jnp.float32)[:, None])
    return slab


def _make_kernel(chunk, n_chunks):
    """Kernel for one batch tile: x_ref (4, tile), p_ref (40, 128), o_ref (2, tile)."""

    def mlp_kernel(x_ref, p_ref, o_ref):
        # Tiny static parameter views, loaded once per grid step (the slab
        # itself is VMEM-resident across steps via its constant index_map).
        w1 = p_ref[0:16, 0:4]        # (16, 4)
        b1 = p_ref[0:16, 4:5]        # (16, 1) -> broadcasts over lanes (batch)
        w2 = p_ref[16:32, 0:16]      # (16, 16)
        b2 = p_ref[16:32, 16:17]
        w3 = p_ref[32:34, 0:16]      # (2, 16)
        b3 = p_ref[32:34, 16:17]

        def body(c, carry):
            off = pl.multiple_of(c * chunk, chunk)          # lane-aligned chunk start
            xc = x_ref[:, pl.ds(off, chunk)]                # (4, chunk) — in vregs
            # fc1 + relu : (16,4) @ (4,chunk) -> (16,chunk)  (stays in vregs)
            h1 = jnp.maximum(
                jnp.dot(w1, xc, preferred_element_type=jnp.float32) + b1, 0.0)
            # fc2 + relu : (16,16) @ (16,chunk) -> (16,chunk)
            h2 = jnp.maximum(
                jnp.dot(w2, h1, preferred_element_type=jnp.float32) + b2, 0.0)
            # fc3 : (2,16) @ (16,chunk) -> (2,chunk), lane-dense store
            o_ref[:, pl.ds(off, chunk)] = (
                jnp.dot(w3, h2, preferred_element_type=jnp.float32) + b3)
            return carry

        lax.fori_loop(0, n_chunks, body, 0, unroll=min(2, n_chunks))

    return mlp_kernel


def _pick_tile(b128):
    """Lane-aligned batch tile.  Big tiles; >=2 grid steps once there is work."""
    if b128 <= 1024:
        return b128                                   # one cheap step; tiny problem
    n_steps = max(2, _cdiv(b128, _MAX_TILE))          # >=2 -> both v7x TCs get work
    return _round_up(_cdiv(b128, n_steps), _LANE)


def _pick_chunk(tile):
    for cw in (512, 256, 128):                        # vreg-resident chunk widths
        if tile % cw == 0:
            return cw
    return _LANE


def cartpole_forward_fm(xt, slab):
    """Feature-major fast path: xt (4, B) f32 -> (2, B) f32 (no wrapper relayout)."""
    assert xt.shape[0] == 4
    B = xt.shape[1]
    b128 = _round_up(max(B, 1), _LANE)
    tile = _pick_tile(b128)
    grid = _cdiv(b128, tile)
    b_pad = grid * tile

    xt = xt.astype(jnp.float32)
    if b_pad != B:
        # Padding is bounded by ~(grid*128) lanes, not a whole tile.
        xt = jnp.pad(xt, ((0, 0), (0, b_pad - B)))

    chunk = _pick_chunk(tile)
    out = pl.pallas_call(
        _make_kernel(chunk, tile // chunk),
        out_shape=jax.ShapeDtypeStruct((2, b_pad), jnp.float32),
        grid_spec=pltpu.PrefetchScalarGridSpec(
            num_scalar_prefetch=0,
            grid=(grid,),
            in_specs=[
                # activations: one big batch tile per grid step (lane-dense)
                pl.BlockSpec((4, tile), lambda i: (0, i)),
                # parameter slab: constant index_map -> VMEM-resident
                pl.BlockSpec((PARAM_ROWS, PARAM_COLS), lambda i: (0, 0)),
            ],
            out_specs=pl.BlockSpec((2, tile), lambda i: (0, i)),
        ),
        compiler_params=pltpu.CompilerParams(
            dimension_semantics=("parallel",),   # batch tiles are independent
        ),
    )(xt, slab)
    return out[:, :B] if b_pad != B else out


def cartpole_forward(x, slab):
    """PyTorch-convention wrapper: x (B, 4) -> (B, 2).

    The transposes here are the only wrapper-side relayout; feature-major
    callers should use `cartpole_forward_fm` directly to avoid them."""
    return cartpole_forward_fm(jnp.asarray(x, jnp.float32).T, slab).T


# ---------------------------------------------------------------------------
# Reference / test harness
# ---------------------------------------------------------------------------
def init_params(key):
    """Deterministic init matching nn.Linear shapes (weight (out,in), bias (out,))."""
    ks = jax.random.split(key, 6)

    def lin(kw, kb, fan_in, fan_out):
        bound = 1.0 / jnp.sqrt(float(fan_in))
        w = jax.random.uniform(kw, (fan_out, fan_in), jnp.float32, -bound, bound)
        b = jax.random.uniform(kb, (fan_out,), jnp.float32, -bound, bound)
        return w, b

    w1, b1 = lin(ks[0], ks[1], 4, 16)
    w2, b2 = lin(ks[2], ks[3], 16, 16)
    w3, b3 = lin(ks[4], ks[5], 16, 2)
    return dict(w1=w1, b1=b1, w2=w2, b2=b2, w3=w3, b3=b3)


def reference_forward(x, p, precision=None):
    h1 = jnp.maximum(jnp.dot(x, p["w1"].T, precision=precision) + p["b1"], 0.0)
    h2 = jnp.maximum(jnp.dot(h1, p["w2"].T, precision=precision) + p["b2"], 0.0)
    return jnp.dot(h2, p["w3"].T, precision=precision) + p["b3"]


def _check_close(out, x, params, tol=1e-3):
    # The MXU may evaluate f32 matmuls with either full-f32-equivalent passes or
    # a reduced-precision (bf16) pass depending on compiler defaults, so accept
    # a close match against EITHER a highest-precision or a default-precision
    # XLA reference.
    ref_hi = reference_forward(x, params, precision=jax.lax.Precision.HIGHEST)
    ref_lo = reference_forward(x, params)
    ok = bool(jnp.allclose(out, ref_hi, atol=tol, rtol=tol)) or \
         bool(jnp.allclose(out, ref_lo, atol=tol, rtol=tol))
    assert ok, (out, ref_hi)


if __name__ == "__main__":
    key = jax.random.PRNGKey(0)
    k_x, k_x2, k_p = jax.random.split(key, 3)

    params = init_params(k_p)
    slab = pack_params(params)          # packed ONCE, reused for every forward

    fwd = jax.jit(cartpole_forward)

    # Cartpole-realistic small batch (B=2, 4 state features).
    x_small = jax.random.normal(k_x, (2, 4), dtype=jnp.float32)
    out_small = jax.block_until_ready(fwd(x_small, slab))
    assert out_small.shape == (2, 2)
    _check_close(out_small, x_small, params)

    # Larger, non-aligned batch: exercises the multi-step ("parallel") grid,
    # the in-kernel chunk loop and the <=few-hundred-lane padding path.
    x_big = jax.random.normal(k_x2, (1111, 4), dtype=jnp.float32)
    out_big = jax.block_until_ready(fwd(x_big, slab))
    assert out_big.shape == (1111, 2)
    _check_close(out_big, x_big, params)

    print("KERNEL_OK")
</pallas_src>

<mosaic_0001>
module attributes {stable_mosaic.version = 11 : i64} {
  func.func @mlp_kernel(%arg0: i32, %arg1: memref<4x128xf32, #tpu.memory_space<vmem>>, %arg2: memref<40x128xf32, #tpu.memory_space<vmem>>, %arg3: memref<2x128xf32, #tpu.memory_space<vmem>>) attributes {dimension_semantics = [#tpu.dimension_semantics<parallel>], iteration_bounds = array<i64: 1>, scalar_prefetch = 0 : i64, scratch_operands = 0 : i64, tpu.core_type = #tpu.core_type<tc>, window_params = [{transform_indices = @transform_0, window_bounds = array<i64: 4, 128>}, {pipeline_mode = #tpu.pipeline_mode<synchronous>, transform_indices = @transform_1, window_bounds = array<i64: 40, 128>}, {transform_indices = @transform_2, window_bounds = array<i64: 2, 128>}]} {
    %c0 = arith.constant 0 : index
    %c0_0 = arith.constant 0 : index
    %0 = vector.load %arg2[%c0, %c0_0] : memref<40x128xf32, #tpu.memory_space<vmem>>, vector<16x4xf32>
    %c0_1 = arith.constant 0 : index
    %c4 = arith.constant 4 : index
    %1 = vector.load %arg2[%c0_1, %c4] : memref<40x128xf32, #tpu.memory_space<vmem>>, vector<16x1xf32>
    %c16 = arith.constant 16 : index
    %c0_2 = arith.constant 0 : index
    %2 = vector.load %arg2[%c16, %c0_2] : memref<40x128xf32, #tpu.memory_space<vmem>>, vector<16x16xf32>
    %c16_3 = arith.constant 16 : index
    %c16_4 = arith.constant 16 : index
    %3 = vector.load %arg2[%c16_3, %c16_4] : memref<40x128xf32, #tpu.memory_space<vmem>>, vector<16x1xf32>
    %c32 = arith.constant 32 : index
    %c0_5 = arith.constant 0 : index
    %4 = vector.load %arg2[%c32, %c0_5] : memref<40x128xf32, #tpu.memory_space<vmem>>, vector<2x16xf32>
    %c32_6 = arith.constant 32 : index
    %c16_7 = arith.constant 16 : index
    %5 = vector.load %arg2[%c32_6, %c16_7] : memref<40x128xf32, #tpu.memory_space<vmem>>, vector<2x1xf32>
    %c0_i32 = arith.constant 0 : i32
    %c128_i32 = arith.constant 128 : i32
    %6 = arith.muli %c0_i32, %c128_i32 : i32
    %7 = tpu.assume_multiple %6, 128 : i32
    %c0_8 = arith.constant 0 : index
    %8 = arith.index_cast %7 : i32 to index
    %9 = vector.load %arg1[%c0_8, %8] : memref<4x128xf32, #tpu.memory_space<vmem>>, vector<4x128xf32>
    %cst = arith.constant dense<0.000000e+00> : vector<16x128xf32>
    %10 = tpu.matmul %0, %9, %cst {dimension_numbers = #tpu.dot_dimension_numbers<[1], [0], [0], [1], [0, 0, 1, 1], [], []>} : vector<16x4xf32>, vector<4x128xf32>, vector<16x128xf32> -> vector<16x128xf32>
    %11 = vector.broadcast %1 : vector<16x1xf32> to vector<16x128xf32>
    %12 = arith.addf %10, %11 : vector<16x128xf32>
    %cst_9 = arith.constant 0.000000e+00 : f32
    %13 = vector.broadcast %cst_9 : f32 to vector<16x128xf32>
    %14 = arith.maximumf %12, %13 : vector<16x128xf32>
    %cst_10 = arith.constant dense<0.000000e+00> : vector<16x128xf32>
    %15 = tpu.matmul %2, %14, %cst_10 {dimension_numbers = #tpu.dot_dimension_numbers<[1], [0], [0], [1], [0, 0, 1, 1], [], []>} : vector<16x16xf32>, vector<16x128xf32>, vector<16x128xf32> -> vector<16x128xf32>
    %16 = vector.broadcast %3 : vector<16x1xf32> to vector<16x128xf32>
    %17 = arith.addf %15, %16 : vector<16x128xf32>
    %cst_11 = arith.constant 0.000000e+00 : f32
    %18 = vector.broadcast %cst_11 : f32 to vector<16x128xf32>
    %19 = arith.maximumf %17, %18 : vector<16x128xf32>
    %cst_12 = arith.constant dense<0.000000e+00> : vector<2x128xf32>
    %20 = tpu.matmul %4, %19, %cst_12 {dimension_numbers = #tpu.dot_dimension_numbers<[1], [0], [0], [1], [0, 0, 1, 1], [], []>} : vector<2x16xf32>, vector<16x128xf32>, vector<2x128xf32> -> vector<2x128xf32>
    %21 = vector.broadcast %5 : vector<2x1xf32> to vector<2x128xf32>
    %22 = arith.addf %20, %21 : vector<2x128xf32>
    %c0_13 = arith.constant 0 : index
    %23 = arith.index_cast %7 : i32 to index
    %24 = vector.load %arg3[%c0_13, %23] : memref<2x128xf32, #tpu.memory_space<vmem>>, vector<2x128xf32>
    tpu.vector_store %arg3[%c0_13, %23], %22 {strides = array<i32>} : memref<2x128xf32, #tpu.memory_space<vmem>>, vector<2x128xf32>,
    %c1_i32 = arith.constant 1 : i32
    return
  }
  func.func @transform_0(%arg0: i32) -> (i32, i32) {
    %c0_i32 = arith.constant 0 : i32
    %c0_i32_0 = arith.constant 0 : i32
    return %c0_i32, %arg0 : i32, i32
  }
  func.func @transform_1(%arg0: i32) -> (i32, i32) {
    %c0_i32 = arith.constant 0 : i32
    %c0_i32_0 = arith.constant 0 : i32
    %c0_i32_1 = arith.constant 0 : i32
    return %c0_i32, %c0_i32_0 : i32, i32
  }
  func.func @transform_2(%arg0: i32) -> (i32, i32) {
    %c0_i32 = arith.constant 0 : i32
    %c0_i32_0 = arith.constant 0 : i32
    return %c0_i32, %arg0 : i32, i32
  }
}

</mosaic_0001>

<bundles_post_ra>
// kernel: cartpole_forward.1
= control target key start
LH: loop header
LB: loop body
LE: loop exit
PB: predicated region body
PF: predicated region fallthrough
CT: control target
= control target key end

     0   :  { %7 = vsyncpa [#allocation3], 0  ;;  %s193_s12 = smov [#allocation2]   ;;  %s194_s14 = smov 128   ;;  %s225_s0 = inlined_call_operand.vmem [shape: f32[4,128], index: 0, kind: input, shape index: {}]   ;;  %s226_s1 = inlined_call_operand.hbm [shape: f32[40,128], index: 1, kind: input, shape index: {}]   ;;  %s227_s2 = inlined_call_operand.vmem [shape: f32[2,128], index: 2, kind: output, shape index: {}]  }
   0x1   :  { %s14_s11 = sshll.u32 %s226_s1, 4  ;;  %s16_s13 = sshll.u32 %s193_s12, 4  ;;  %s15_s11 = int_to_ptr.hbm [resolvable:$true] %s14_s11  ;;  %s17_s13 = int_to_ptr.vmem [resolvable:$true] %s16_s13 }
   0x2   :  { %s195_s15 = smov 8  }
   0x3   :  { %22 = dma.hbm_to_vmem [thread:$0]  %s15_s11, 640, %s17_s13, [#allocation3], %s194_s14, %s194_s14, %s195_s15  }
   0x4   :  { %191 = dma.done.wait [#allocation3], 640  }
   0x5   :  { %192 = vsyncadd [#allocation3], 4294966656  ;;  %v196_v0 = vmov 4   ;;  %vm48_vm0 = vcmask 1043456   ;;  %vm43_vm1 = vcmask 31744   ;;  %v27_v2 = vld [vmem:[#allocation2] sm:$0xff] }
   0x6   :  { %163 = vset.pattern.permute.xlu0 %v196_v0  ;;  %v32_v1 = vld [vmem:[%s225_s0] sm:$0xf]  ;;  %v28_v3 = vld [vmem:[#allocation2 + $0x8] sm:$0xff]  ;;  %v30_v4 = vld [vmem:[#allocation2 + $0x18] sm:$0xff]  ;;  %v197_v5 = vmov 16   ;;  %vm87_vm2 = vcmask 130048  }
   0x7   :  { %150 = vmatpush.msk.msra.mxu0 %vm48_vm0, %v32_v1  ;;  %40 = vperm.xlu0 %163, %v28_v3   ;;  %v29_v6 = vld [vmem:[#allocation2 + $0x10] sm:$0xff]  ;;  %v31_v15 = vld [vmem:[#allocation2 + $0x20] sm:$0x3] }
   0x8   :  { %151 = vmatmul.msk.f32.vlgmr.msra.gmra.mxu0 %vm43_vm1, %v27_v2  ;;  %164 = vset.pattern.permute.xlu1 %v197_v5 }
   0x9   :  { %165 = vset.pattern.permute.xlu2 %v197_v5  ;;  %84 = vperm.xlu1 %164, %v30_v4  }
   0xa   :  { %119 = vperm.xlu2 %165, %v31_v15  }
   0xf   :  { %35 = vperm.xlu0 %163, %v27_v2  }
  0x10   :  { %152 = vmatmul.msk.f32.gmra.mxu0 %vm43_vm1, %v28_v3 }
  0x11   :  { %79 = vperm.xlu1 %164, %v29_v6  }
  0x17   :  { %166 = vset.pattern.permute.xlu0 %v197_v5 }
  0x64   :  { %v120_v24 = vpop.permute.xlu2 %119 }
  0x79   :  { %v41_v7 = vpop.permute.xlu0 %40 }
  0x7b   :  { %v85_v16 = vpop.permute.xlu1 %84 }
  0x81   :  { %v36_v9 = vpop.permute.xlu0 %35 }
  0x83   :  { %v80_v17 = vpop.permute.xlu1 %79 }
  0x85   :  { %v69_v8 = vpop.f32.mrf.mxu0 }
  0x86   :  { %v70_v11 = vadd.f32 %v69_v8, %v36_v9 }
  0x88   :  { %v75_v14 = vmax.f32 %v70_v11, 0.0 }
  0x8d   :  { %v72_v10 = vpop.f32.mrf.mxu0 }
  0x8e   :  { %v73_v12 = vadd.f32 %v72_v10, %v41_v7 }
  0x90   :  { %v76_v13 = vmax.f32 %v73_v12, 0.0 }
  0x92   :  { %106 = vmatpush.msra.mxu1 %v76_v13  ;;  %156 = vmatpush.msra.mxu3 %v76_v13 }
  0x94   :  { %107 = vmatpush.msra.mxu1 %v75_v14  ;;  %157 = vmatpush.msra.mxu3 %v75_v14 }
  0x95   :  { %153 = vmatmul.msk.f32.vlgmr.msra.gmra.mxu1 %vm87_vm2, %v29_v6  ;;  %154 = vmatmul.msk.f32.vlgmr.msra.gmra.mxu3 %vm87_vm2, %v30_v4 }
 0x112   :  { %v109_v18 = vpop.f32.mrf.mxu1 }
 0x113   :  { %v110_v20 = vadd.f32 %v109_v18, %v80_v17 }
 0x115   :  { %v115_v23 = vmax.f32 %v110_v20, 0.0 }
 0x118   :  { %v112_v19 = vpop.f32.mrf.mxu3 }
 0x119   :  { %v113_v21 = vadd.f32 %v112_v19, %v85_v16 }
 0x11b   :  { %v116_v22 = vmax.f32 %v113_v21, 0.0 }
 0x11d   :  { %138 = vmatpush.msra.mxu2 %v116_v22 }
 0x11f   :  { %139 = vmatpush.msra.mxu2 %v115_v23 }
 0x120   :  { %155 = vmatmul.msk.f32.vlgmr.msra.gmra.mxu2 %vm87_vm2, %v31_v15 }
 0x1a3   :  { %v141_v25 = vpop.f32.mrf.mxu2 }
 0x1a4   :  { %v142_v26 = vadd.f32 %v141_v25, %v120_v24 }
 0x1a6   :  { %144 = vst [vmem:[%s227_s2] sm:$0x3] %v142_v26 }
 0x1a7   :  { %149 = vsyncpa [#allocation3], 1 }

</bundles_post_ra>
